<compile_context>
chip_gen: v6e
topology: v6e:2x2x1
jax: 0.10.0
libtpu: 0.0.40
codegen_flags: <defaults>
</compile_context>

<pallas_src>
import functools

import numpy as np

import jax
import jax.numpy as jnp
from jax import lax
from jax.experimental import pallas as pl
from jax.experimental.pallas import tpu as pltpu

# ----------------------------- configuration --------------------------------
B = 2                          # batch of images
IMG = 32                       # input image spatial size (NCHW: [B, 3, IMG, IMG])
PATCH = 8                      # patch size of the simplified ViT image encoder
GRID = IMG // PATCH            # 4  -> low-res mask grid
HW = GRID * GRID               # 16 image tokens
PATCH_DIM = 3 * PATCH * PATCH  # 192
C = 256                        # SAM embedding dim (sam_query is nn.Parameter(1, 256))
ORIG = 32                      # original_size (label_list[i].shape) for all images
OO = ORIG * ORIG               # 1024 = 8*128 -> lane-dense per-image output row
DICE_LOSS_WEIGHT = 0.5
BCE_LOSS_WEIGHT = 2.0

_F32 = jnp.float32
_BF16 = jnp.bfloat16


# --------------------- static bilinear interpolation matrix ------------------
def _bilinear_matrix(dst, src):
    """1-D bilinear interpolation matrix U[dst, src] (half-pixel centers)."""
    o = np.arange(dst, dtype=np.float64)
    x = (o + 0.5) * (src / dst) - 0.5
    x = np.clip(x, 0.0, src - 1.0)
    g0 = np.floor(x).astype(np.int64)
    g1 = np.minimum(g0 + 1, src - 1)
    frac = x - g0
    U = np.zeros((dst, src), dtype=np.float64)
    U[np.arange(dst), g0] += 1.0 - frac
    U[np.arange(dst), g1] += frac
    return U.astype(np.float32)


@functools.lru_cache(maxsize=None)
def _upsample_matrix_np(grid, orig):
    # Shared (not batch-duplicated) 2-D bilinear upsample expressed as one
    # matmul:  w_up[g*grid + h, o*orig + p] = U[o, g] * U[p, h].
    U = _bilinear_matrix(orig, grid)
    return np.ascontiguousarray(np.kron(U, U).T.astype(np.float32))


def _upsample_matrix(grid, orig):
    return jnp.asarray(_upsample_matrix_np(grid, orig))


# ------------------------------ kernel core ----------------------------------
def _sam_image_core(patches_ref, pw_ref, prompt_ref, q_ref, up_ref):
    """Stand-in SAM dataflow for ONE image: patch embed -> dense prompt add
    -> mask-token/image contraction -> bilinear GRID->ORIG upsample."""
    # patch embed: [HW, PATCH_DIM] @ [PATCH_DIM, C]  (bf16 MXU, f32 accumulate)
    emb = jnp.dot(patches_ref[0], pw_ref[...], preferred_element_type=_F32)
    # dense positional encoding + no-mask dense prompt (pre-summed in wrapper)
    feats = emb + prompt_ref[...].astype(_F32)                       # [HW, C]
    # low-res mask logits: q [1, C] contracted against image tokens -> [1, HW]
    lm = lax.dot_general(q_ref[...], feats.astype(_BF16),
                         (((1,), (1,)), ((), ())),
                         preferred_element_type=_F32)
    # bilinear upsample GRID*GRID -> ORIG*ORIG as one matmul with the shared
    # interpolation matrix; output is a lane-dense [1, 1024] row.
    return jnp.dot(lm.astype(_BF16), up_ref[...], preferred_element_type=_F32)


def _sam_train_kernel(patches_ref, pw_ref, prompt_ref, q_ref, up_ref, gt_ref,
                      out_ref, bce_acc, dice_acc):
    i = pl.program_id(0)

    @pl.when(i == 0)
    def _():
        bce_acc[...] = jnp.zeros_like(bce_acc)
        dice_acc[...] = jnp.zeros_like(dice_acc)

    x = _sam_image_core(patches_ref, pw_ref, prompt_ref, q_ref, up_ref)  # [1, OO]
    z = gt_ref[0]                                                        # [1, OO]

    # TODO(synk): at larger B / real scale, run this chain on an [8, OO//8]
    #             view for full sublane occupancy of the EUP/VPU.
    e = jnp.exp(-jnp.abs(x))                       # shared transcendental (EUP)
    bce = jnp.maximum(x, 0.0) - x * z + jnp.log1p(e)
    inv = 1.0 / (1.0 + e)                          # exact reciprocal (correctness)
    sig = jnp.where(x >= 0.0, inv, e * inv)        # numerically stable sigmoid

    # per-image reductions: plain lane reductions, no segment-sum matmul
    bce_sum = jnp.sum(bce, axis=-1, keepdims=True)          # [1, 1]
    inter = jnp.sum(sig * z, axis=-1, keepdims=True)
    sig_sum = jnp.sum(sig, axis=-1, keepdims=True)
    gt_sum = jnp.sum(z, axis=-1, keepdims=True)

    # exact sigmoid_ce_loss / dice_loss semantics of the reference module
    n_i = 1.0                    # gt_mask.shape[0] == 1 mask per image (assumption)
    scale, eps = 1000.0, 1e-6
    bce_per = (bce_sum / float(OO)) / (n_i + 1e-8) * n_i
    numer = 2.0 * inter / scale
    denom = (sig_sum + gt_sum) / scale
    dice_per = (1.0 - (numer + eps) / (denom + eps)) / (n_i + 1e-8) * n_i

    bce_acc[...] += bce_per
    dice_acc[...] += dice_per

    @pl.when(i == pl.num_programs(0) - 1)
    def _():
        num_masks = n_i * pl.num_programs(0)
        mask_bce = BCE_LOSS_WEIGHT * bce_acc[...] / (num_masks + 1e-8)
        mask_dice = DICE_LOSS_WEIGHT * dice_acc[...] / (num_masks + 1e-8)
        # pack [bce, dice, total] into one (3, 1) output (single tiny writeback)
        out_ref[...] = jnp.concatenate(
            [mask_bce, mask_dice, mask_bce + mask_dice], axis=0)


def _sam_infer_kernel(patches_ref, pw_ref, prompt_ref, q_ref, up_ref, mask_ref):
    mask_ref[0] = _sam_image_core(patches_ref, pw_ref, prompt_ref, q_ref, up_ref)


# ------------------------------ parameter init -------------------------------
def init_params(key):
    ks = jax.random.split(key, 6)
    # TODO(synk): build_sam_vit_h checkpoint weights are not available; the
    # stand-in params below are deterministic random tensors of sane shapes.
    return {
        "sam_query": jax.random.normal(ks[0], (1, C), _F32),          # nn.Parameter(1, 256)
        "patch_embed_w": 0.02 * jax.random.normal(ks[1], (PATCH_DIM, C), _F32),
        "dense_pe": 0.02 * jax.random.normal(ks[2], (HW, C), _F32),   # get_dense_pe()
        "no_mask_embed": 0.02 * jax.random.normal(ks[3], (1, C), _F32),
        "wq": 0.02 * jax.random.normal(ks[4], (C, C), _F32),          # decoder token MLP
        "wiou": 0.02 * jax.random.normal(ks[5], (C, 1), _F32),        # iou head
    }


# ------------------------------ forward pass ---------------------------------
def model_forward(params, images, gt_masks, inference=False):
    """images: NCHW float32 [B, 3, IMG, IMG]; gt_masks: [B, 1, ORIG, ORIG]."""
    b = images.shape[0]

    # ---- XLA-side layout plumbing + input-independent parameter-only ops ----
    # TODO(synk): at real ViT-H input sizes, fold this NCHW->patch transpose
    #             into the kernel (index_map over patch blocks).
    patches = images.reshape(b, 3, GRID, PATCH, GRID, PATCH)
    patches = patches.transpose(0, 2, 4, 1, 3, 5).reshape(b, HW, PATCH_DIM)

    q = jnp.tanh(params["sam_query"] @ params["wq"])               # hoisted token MLP [1, C]
    prompt = params["dense_pe"] + params["no_mask_embed"]          # hoisted dense prompt [HW, C]
    w_up = _upsample_matrix(GRID, ORIG)                            # shared [HW, OO]

    # bf16 MXU operands (halved DMA); f32 accumulation happens inside the kernel
    ins = (patches.astype(_BF16), params["patch_embed_w"].astype(_BF16),
           prompt.astype(_BF16), q.astype(_BF16), w_up.astype(_BF16))

    common_specs = [
        pl.BlockSpec((1, HW, PATCH_DIM), lambda i: (i, 0, 0)),   # per-image patches
        pl.BlockSpec((PATCH_DIM, C), lambda i: (0, 0)),          # resident weights
        pl.BlockSpec((HW, C), lambda i: (0, 0)),
        pl.BlockSpec((1, C), lambda i: (0, 0)),
        pl.BlockSpec((HW, OO), lambda i: (0, 0)),
    ]

    if inference:
        mask = pl.pallas_call(
            _sam_infer_kernel,
            out_shape=jax.ShapeDtypeStruct((b, 1, OO), _F32),
            grid=(b,),
            in_specs=common_specs,
            out_specs=pl.BlockSpec((1, 1, OO), lambda i: (i, 0, 0)),
            compiler_params=pltpu.CompilerParams(
                dimension_semantics=("parallel",)),
        )(*ins)
        pred_masks = mask.reshape(b, ORIG, ORIG)
        # iou head is input-independent -> computed once in the wrapper
        iou_pred = jnp.broadcast_to(q @ params["wiou"], (b, 1))
        return {"pred_masks": pred_masks, "gt_masks": gt_masks,
                "iou_predictions": iou_pred}

    gt = gt_masks.astype(_F32).reshape(b, 1, OO)
    stats = pl.pallas_call(
        _sam_train_kernel,
        out_shape=jax.ShapeDtypeStruct((3, 1), _F32),
        grid=(b,),
        in_specs=common_specs + [pl.BlockSpec((1, 1, OO), lambda i: (i, 0, 0))],
        out_specs=pl.BlockSpec((3, 1), lambda i: (0, 0)),
        scratch_shapes=[pltpu.VMEM((1, 1), _F32), pltpu.VMEM((1, 1), _F32)],
        compiler_params=pltpu.CompilerParams(
            dimension_semantics=("arbitrary",)),
    )(*ins, gt)

    mask_bce_loss = stats[0, 0]
    mask_dice_loss = stats[1, 0]
    mask_loss = stats[2, 0]
    return {
        "loss": mask_loss,
        "mask_bce_loss": mask_bce_loss,
        "mask_dice_loss": mask_dice_loss,
        "mask_loss": mask_loss,
    }


# ----------------------------------- main ------------------------------------
if __name__ == "__main__":
    key = jax.random.PRNGKey(0)
    k_param, k_img, k_msk = jax.random.split(key, 3)

    params = init_params(k_param)
    images = jax.random.normal(k_img, (B, 3, IMG, IMG), _F32)            # NCHW
    gt_masks = jax.random.bernoulli(k_msk, 0.5, (B, 1, ORIG, ORIG)).astype(_F32)

    out = model_forward(params, images, gt_masks, inference=False)
    out = jax.tree_util.tree_map(jax.block_until_ready, out)

    inf = model_forward(params, images, gt_masks, inference=True)
    inf = jax.tree_util.tree_map(jax.block_until_ready, inf)

    assert jnp.isfinite(out["loss"]).item()
    assert inf["pred_masks"].shape == (B, ORIG, ORIG)
    assert inf["iou_predictions"].shape == (B, 1)
    print("KERNEL_OK")
</pallas_src>

<mosaic_0001>
module attributes {stable_mosaic.version = 11 : i64} {
  func.func @_sam_train_kernel(%arg0: i32, %arg1: memref<1x16x192xbf16, #tpu.memory_space<vmem>>, %arg2: memref<192x256xbf16, #tpu.memory_space<vmem>>, %arg3: memref<16x256xbf16, #tpu.memory_space<vmem>>, %arg4: memref<1x256xbf16, #tpu.memory_space<vmem>>, %arg5: memref<16x1024xbf16, #tpu.memory_space<vmem>>, %arg6: memref<1x1x1024xf32, #tpu.memory_space<vmem>>, %arg7: memref<3x1xf32, #tpu.memory_space<vmem>>, %arg8: memref<1x1xf32, #tpu.memory_space<vmem>>, %arg9: memref<1x1xf32, #tpu.memory_space<vmem>>) attributes {dimension_semantics = [#tpu.dimension_semantics<arbitrary>], iteration_bounds = array<i64: 2>, scalar_prefetch = 0 : i64, scratch_operands = 2 : i64, tpu.core_type = #tpu.core_type<tc>, window_params = [{transform_indices = @transform_0, window_bounds = array<i64: 1, 16, 192>}, {pipeline_mode = #tpu.pipeline_mode<synchronous>, transform_indices = @transform_1, window_bounds = array<i64: 192, 256>}, {pipeline_mode = #tpu.pipeline_mode<synchronous>, transform_indices = @transform_2, window_bounds = array<i64: 16, 256>}, {pipeline_mode = #tpu.pipeline_mode<synchronous>, transform_indices = @transform_3, window_bounds = array<i64: 1, 256>}, {pipeline_mode = #tpu.pipeline_mode<synchronous>, transform_indices = @transform_4, window_bounds = array<i64: 16, 1024>}, {transform_indices = @transform_5, window_bounds = array<i64: 1, 1, 1024>}, {pipeline_mode = #tpu.pipeline_mode<synchronous>, transform_indices = @transform_6, window_bounds = array<i64: 3, 1>}]} {
    %c0_i32 = arith.constant 0 : i32
    %0 = arith.cmpi eq, %arg0, %c0_i32 : i32
    %1 = arith.extui %0 : i1 to i32
    %c0_i32_0 = arith.constant 0 : i32
    %2 = arith.cmpi ne, %1, %c0_i32_0 : i32
    scf.if %2 {
      %cst_45 = arith.constant 0.000000e+00 : f32
      %78 = vector.broadcast %cst_45 : f32 to vector<1x1xf32>
      %c0_46 = arith.constant 0 : index
      %c0_47 = arith.constant 0 : index
      %79 = vector.load %arg8[%c0_46, %c0_47] : memref<1x1xf32, #tpu.memory_space<vmem>>, vector<1x1xf32>
      tpu.vector_store %arg8[%c0_46, %c0_47], %78 {strides = array<i32>} : memref<1x1xf32, #tpu.memory_space<vmem>>, vector<1x1xf32>,
      %cst_48 = arith.constant 0.000000e+00 : f32
      %80 = vector.broadcast %cst_48 : f32 to vector<1x1xf32>
      %c0_49 = arith.constant 0 : index
      %c0_50 = arith.constant 0 : index
      %81 = vector.load %arg9[%c0_49, %c0_50] : memref<1x1xf32, #tpu.memory_space<vmem>>, vector<1x1xf32>
      tpu.vector_store %arg9[%c0_49, %c0_50], %80 {strides = array<i32>} : memref<1x1xf32, #tpu.memory_space<vmem>>, vector<1x1xf32>,
    } else {
    }
    %c0 = arith.constant 0 : index
    %c0_1 = arith.constant 0 : index
    %c0_2 = arith.constant 0 : index
    %3 = vector.load %arg1[%c0, %c0_1, %c0_2] : memref<1x16x192xbf16, #tpu.memory_space<vmem>>, vector<1x16x192xbf16>
    %4 = vector.shape_cast %3 : vector<1x16x192xbf16> to vector<16x192xbf16>
    %c0_3 = arith.constant 0 : index
    %c0_4 = arith.constant 0 : index
    %5 = vector.load %arg2[%c0_3, %c0_4] : memref<192x256xbf16, #tpu.memory_space<vmem>>, vector<192x256xbf16>
    %cst = arith.constant dense<0.000000e+00> : vector<16x256xf32>
    %6 = tpu.matmul %4, %5, %cst {dimension_numbers = #tpu.dot_dimension_numbers<[1], [0], [0], [1], [0, 0, 1, 1], [], []>} : vector<16x192xbf16>, vector<192x256xbf16>, vector<16x256xf32> -> vector<16x256xf32>
    %c0_5 = arith.constant 0 : index
    %c0_6 = arith.constant 0 : index
    %7 = vector.load %arg3[%c0_5, %c0_6] : memref<16x256xbf16, #tpu.memory_space<vmem>>, vector<16x256xbf16>
    %8 = arith.extf %7 : vector<16x256xbf16> to vector<16x256xf32>
    %9 = arith.addf %6, %8 : vector<16x256xf32>
    %c0_7 = arith.constant 0 : index
    %c0_8 = arith.constant 0 : index
    %10 = vector.load %arg4[%c0_7, %c0_8] : memref<1x256xbf16, #tpu.memory_space<vmem>>, vector<1x256xbf16>
    %11 = arith.truncf %9 : vector<16x256xf32> to vector<16x256xbf16>
    %cst_9 = arith.constant dense<0.000000e+00> : vector<1x16xf32>
    %12 = tpu.matmul %10, %11, %cst_9 {dimension_numbers = #tpu.dot_dimension_numbers<[1], [1], [0], [0], [0, 0, 1, 0], [], []>} : vector<1x256xbf16>, vector<16x256xbf16>, vector<1x16xf32> -> vector<1x16xf32>
    %13 = arith.truncf %12 : vector<1x16xf32> to vector<1x16xbf16>
    %c0_10 = arith.constant 0 : index
    %c0_11 = arith.constant 0 : index
    %14 = vector.load %arg5[%c0_10, %c0_11] : memref<16x1024xbf16, #tpu.memory_space<vmem>>, vector<16x1024xbf16>
    %cst_12 = arith.constant dense<0.000000e+00> : vector<1x1024xf32>
    %15 = tpu.matmul %13, %14, %cst_12 {dimension_numbers = #tpu.dot_dimension_numbers<[1], [0], [0], [1], [0, 0, 1, 1], [], []>} : vector<1x16xbf16>, vector<16x1024xbf16>, vector<1x1024xf32> -> vector<1x1024xf32>
    %c0_13 = arith.constant 0 : index
    %c0_14 = arith.constant 0 : index
    %c0_15 = arith.constant 0 : index
    %16 = vector.load %arg6[%c0_13, %c0_14, %c0_15] : memref<1x1x1024xf32, #tpu.memory_space<vmem>>, vector<1x1x1024xf32>
    %17 = vector.shape_cast %16 : vector<1x1x1024xf32> to vector<1x1024xf32>
    %18 = math.absf %15 : vector<1x1024xf32>
    %cst_16 = arith.constant 0.000000e+00 : f32
    %19 = vector.broadcast %cst_16 : f32 to vector<1x1024xf32>
    %20 = arith.subf %19, %18 : vector<1x1024xf32>
    %21 = math.exp %20 : vector<1x1024xf32>
    %cst_17 = arith.constant 0.000000e+00 : f32
    %22 = vector.broadcast %cst_17 : f32 to vector<1x1024xf32>
    %23 = arith.maximumf %15, %22 : vector<1x1024xf32>
    %24 = arith.mulf %15, %17 : vector<1x1024xf32>
    %25 = arith.subf %23, %24 : vector<1x1024xf32>
    %26 = math.log1p %21 : vector<1x1024xf32>
    %27 = arith.addf %25, %26 : vector<1x1024xf32>
    %cst_18 = arith.constant 1.000000e+00 : f32
    %28 = vector.broadcast %cst_18 : f32 to vector<1x1024xf32>
    %29 = arith.addf %28, %21 : vector<1x1024xf32>
    %cst_19 = arith.constant 1.000000e+00 : f32
    %30 = vector.broadcast %cst_19 : f32 to vector<1x1024xf32>
    %31 = arith.divf %30, %29 : vector<1x1024xf32>
    %cst_20 = arith.constant 0.000000e+00 : f32
    %32 = vector.broadcast %cst_20 : f32 to vector<1x1024xf32>
    %33 = arith.cmpf oge, %15, %32 : vector<1x1024xf32>
    %34 = arith.mulf %21, %31 : vector<1x1024xf32>
    %35 = arith.select %33, %31, %34 : vector<1x1024xi1>, vector<1x1024xf32>
    %cst_21 = arith.constant dense<0.000000e+00> : vector<1xf32>
    %36 = vector.multi_reduction <add>, %27, %cst_21 [1] : vector<1x1024xf32> to vector<1xf32>
    %37 = vector.shape_cast %36 : vector<1xf32> to vector<1x1xf32>
    %38 = arith.mulf %35, %17 : vector<1x1024xf32>
    %cst_22 = arith.constant dense<0.000000e+00> : vector<1xf32>
    %39 = vector.multi_reduction <add>, %38, %cst_22 [1] : vector<1x1024xf32> to vector<1xf32>
    %40 = vector.shape_cast %39 : vector<1xf32> to vector<1x1xf32>
    %cst_23 = arith.constant dense<0.000000e+00> : vector<1xf32>
    %41 = vector.multi_reduction <add>, %35, %cst_23 [1] : vector<1x1024xf32> to vector<1xf32>
    %42 = vector.shape_cast %41 : vector<1xf32> to vector<1x1xf32>
    %cst_24 = arith.constant dense<0.000000e+00> : vector<1xf32>
    %43 = vector.multi_reduction <add>, %17, %cst_24 [1] : vector<1x1024xf32> to vector<1xf32>
    %44 = vector.shape_cast %43 : vector<1xf32> to vector<1x1xf32>
    %cst_25 = arith.constant 1.024000e+03 : f32
    %45 = vector.broadcast %cst_25 : f32 to vector<1x1xf32>
    %46 = arith.divf %37, %45 : vector<1x1xf32>
    %cst_26 = arith.constant 1.000000e+00 : f32
    %47 = vector.broadcast %cst_26 : f32 to vector<1x1xf32>
    %48 = arith.divf %46, %47 : vector<1x1xf32>
    %cst_27 = arith.constant 1.000000e+00 : f32
    %49 = vector.broadcast %cst_27 : f32 to vector<1x1xf32>
    %50 = arith.mulf %48, %49 : vector<1x1xf32>
    %cst_28 = arith.constant 2.000000e+00 : f32
    %51 = vector.broadcast %cst_28 : f32 to vector<1x1xf32>
    %52 = arith.mulf %51, %40 : vector<1x1xf32>
    %cst_29 = arith.constant 1.000000e+03 : f32
    %53 = vector.broadcast %cst_29 : f32 to vector<1x1xf32>
    %54 = arith.divf %52, %53 : vector<1x1xf32>
    %55 = arith.addf %42, %44 : vector<1x1xf32>
    %cst_30 = arith.constant 1.000000e+03 : f32
    %56 = vector.broadcast %cst_30 : f32 to vector<1x1xf32>
    %57 = arith.divf %55, %56 : vector<1x1xf32>
    %cst_31 = arith.constant 9.99999997E-7 : f32
    %58 = vector.broadcast %cst_31 : f32 to vector<1x1xf32>
    %59 = arith.addf %54, %58 : vector<1x1xf32>
    %cst_32 = arith.constant 9.99999997E-7 : f32
    %60 = vector.broadcast %cst_32 : f32 to vector<1x1xf32>
    %61 = arith.addf %57, %60 : vector<1x1xf32>
    %62 = arith.divf %59, %61 : vector<1x1xf32>
    %cst_33 = arith.constant 1.000000e+00 : f32
    %63 = vector.broadcast %cst_33 : f32 to vector<1x1xf32>
    %64 = arith.subf %63, %62 : vector<1x1xf32>
    %cst_34 = arith.constant 1.000000e+00 : f32
    %65 = vector.broadcast %cst_34 : f32 to vector<1x1xf32>
    %66 = arith.divf %64, %65 : vector<1x1xf32>
    %cst_35 = arith.constant 1.000000e+00 : f32
    %67 = vector.broadcast %cst_35 : f32 to vector<1x1xf32>
    %68 = arith.mulf %66, %67 : vector<1x1xf32>
    %c0_36 = arith.constant 0 : index
    %c0_37 = arith.constant 0 : index
    %69 = vector.load %arg8[%c0_36, %c0_37] : memref<1x1xf32, #tpu.memory_space<vmem>>, vector<1x1xf32>
    %70 = arith.addf %69, %50 : vector<1x1xf32>
    %c0_38 = arith.constant 0 : index
    %c0_39 = arith.constant 0 : index
    %71 = vector.load %arg8[%c0_38, %c0_39] : memref<1x1xf32, #tpu.memory_space<vmem>>, vector<1x1xf32>
    tpu.vector_store %arg8[%c0_38, %c0_39], %70 {strides = array<i32>} : memref<1x1xf32, #tpu.memory_space<vmem>>, vector<1x1xf32>,
    %c0_40 = arith.constant 0 : index
    %c0_41 = arith.constant 0 : index
    %72 = vector.load %arg9[%c0_40, %c0_41] : memref<1x1xf32, #tpu.memory_space<vmem>>, vector<1x1xf32>
    %73 = arith.addf %72, %68 : vector<1x1xf32>
    %c0_42 = arith.constant 0 : index
    %c0_43 = arith.constant 0 : index
    %74 = vector.load %arg9[%c0_42, %c0_43] : memref<1x1xf32, #tpu.memory_space<vmem>>, vector<1x1xf32>
    tpu.vector_store %arg9[%c0_42, %c0_43], %73 {strides = array<i32>} : memref<1x1xf32, #tpu.memory_space<vmem>>, vector<1x1xf32>,
    %c1_i32 = arith.constant 1 : i32
    %75 = arith.cmpi eq, %arg0, %c1_i32 : i32
    %76 = arith.extui %75 : i1 to i32
    %c0_i32_44 = arith.constant 0 : i32
    %77 = arith.cmpi ne, %76, %c0_i32_44 : i32
    scf.if %77 {
      %c0_45 = arith.constant 0 : index
      %c0_46 = arith.constant 0 : index
      %78 = vector.load %arg8[%c0_45, %c0_46] : memref<1x1xf32, #tpu.memory_space<vmem>>, vector<1x1xf32>
      %cst_47 = arith.constant 2.000000e+00 : f32
      %79 = vector.broadcast %cst_47 : f32 to vector<1x1xf32>
      %80 = arith.mulf %79, %78 : vector<1x1xf32>
      %cst_48 = arith.constant 2.000000e+00 : f32
      %81 = vector.broadcast %cst_48 : f32 to vector<1x1xf32>
      %82 = arith.divf %80, %81 : vector<1x1xf32>
      %c0_49 = arith.constant 0 : index
      %c0_50 = arith.constant 0 : index
      %83 = vector.load %arg9[%c0_49, %c0_50] : memref<1x1xf32, #tpu.memory_space<vmem>>, vector<1x1xf32>
      %cst_51 = arith.constant 5.000000e-01 : f32
      %84 = vector.broadcast %cst_51 : f32 to vector<1x1xf32>
      %85 = arith.mulf %84, %83 : vector<1x1xf32>
      %cst_52 = arith.constant 2.000000e+00 : f32
      %86 = vector.broadcast %cst_52 : f32 to vector<1x1xf32>
      %87 = arith.divf %85, %86 : vector<1x1xf32>
      %88 = arith.addf %82, %87 : vector<1x1xf32>
      %89 = tpu.concatenate %82, %87, %88 in 0 : vector<1x1xf32>, vector<1x1xf32>, vector<1x1xf32> -> vector<3x1xf32>
      %c0_53 = arith.constant 0 : index
      %c0_54 = arith.constant 0 : index
      %90 = vector.load %arg7[%c0_53, %c0_54] : memref<3x1xf32, #tpu.memory_space<vmem>>, vector<3x1xf32>
      tpu.vector_store %arg7[%c0_53, %c0_54], %89 {strides = array<i32>} : memref<3x1xf32, #tpu.memory_space<vmem>>, vector<3x1xf32>,
    } else {
    }
    return
  }
  func.func @transform_0(%arg0: i32) -> (i32, i32, i32) {
    %c0_i32 = arith.constant 0 : i32
    %c0_i32_0 = arith.constant 0 : i32
    %c0_i32_1 = arith.constant 0 : i32
    return %arg0, %c0_i32, %c0_i32_0 : i32, i32, i32
  }
  func.func @transform_1(%arg0: i32) -> (i32, i32) {
    %c0_i32 = arith.constant 0 : i32
    %c0_i32_0 = arith.constant 0 : i32
    %c0_i32_1 = arith.constant 0 : i32
    return %c0_i32, %c0_i32_0 : i32, i32
  }
  func.func @transform_2(%arg0: i32) -> (i32, i32) {
    %c0_i32 = arith.constant 0 : i32
    %c0_i32_0 = arith.constant 0 : i32
    %c0_i32_1 = arith.constant 0 : i32
    return %c0_i32, %c0_i32_0 : i32, i32
  }
  func.func @transform_3(%arg0: i32) -> (i32, i32) {
    %c0_i32 = arith.constant 0 : i32
    %c0_i32_0 = arith.constant 0 : i32
    %c0_i32_1 = arith.constant 0 : i32
    return %c0_i32, %c0_i32_0 : i32, i32
  }
  func.func @transform_4(%arg0: i32) -> (i32, i32) {
    %c0_i32 = arith.constant 0 : i32
    %c0_i32_0 = arith.constant 0 : i32
    %c0_i32_1 = arith.constant 0 : i32
    return %c0_i32, %c0_i32_0 : i32, i32
  }
  func.func @transform_5(%arg0: i32) -> (i32, i32, i32) {
    %c0_i32 = arith.constant 0 : i32
    %c0_i32_0 = arith.constant 0 : i32
    %c0_i32_1 = arith.constant 0 : i32
    return %arg0, %c0_i32, %c0_i32_0 : i32, i32, i32
  }
  func.func @transform_6(%arg0: i32) -> (i32, i32) {
    %c0_i32 = arith.constant 0 : i32
    %c0_i32_0 = arith.constant 0 : i32
    %c0_i32_1 = arith.constant 0 : i32
    return %c0_i32, %c0_i32_0 : i32, i32
  }
}

</mosaic_0001>

<bundles_post_ra>
// kernel: tpu_custom_call.1
= control target key start
LH: loop header
LB: loop body
LE: loop exit
PB: predicated region body
PF: predicated region fallthrough
CT: control target
= control target key end

     0   :  { %s2239_s0 = inlined_call_operand.hbm [shape: bf16[2,16,192], index: 0, kind: input, shape index: {}]   ;;  %s2240_s1 = inlined_call_operand.hbm [shape: bf16[192,256], index: 1, kind: input, shape index: {}]   ;;  %s2241_s2 = inlined_call_operand.hbm [shape: bf16[16,256], index: 2, kind: input, shape index: {}]   ;;  %s2242_s3 = inlined_call_operand.vmem [shape: bf16[1,256], index: 3, kind: input, shape index: {}]   ;;  %s2243_s4 = inlined_call_operand.hbm [shape: bf16[16,1024], index: 4, kind: input, shape index: {}]   ;;  %s2244_s5 = inlined_call_operand.hbm [shape: f32[2,1,1024], index: 5, kind: input, shape index: {}]   ;;  %s2245_s6 = inlined_call_operand.vmem [shape: f32[3,1], index: 6, kind: output, shape index: {}]  }
   0x1   :  { %2251 = sst [smem:[#allocation16_spill]] %s2239_s0 }
   0x2   :  { %2252 = sst [smem:[#allocation17_spill]] %s2240_s1 }
   0x3   :  { %11 = vsyncpa [#allocation5], 0 }
   0x4   :  { %13 = vsyncpa [#allocation5 + $0x1], 0 }
   0x5   :  { %14 = vsyncpa [#allocation7], 0 }
   0x6   :  { %15 = vsyncpa [#allocation10], 0  ;;  %s1740_s21 = smov 0   ;;  %s1742_s22 = smov 0  }
   0x7   :  { %s1744_s23 = smov 0   ;;  %s1746_s24 = smov 0  }
   0x8 LB: > { %s1759_s25 = sadd.s32 4294967295, %s1691_s24   ;;  %p41_p0 = scmp.ne.s32.totalorder %s1683_s22, %s1679_s21  ;;  %s1691_s24 = sphi %s1746_s24, %s2284_s24   ;;  %s1687_s23 = sphi %s1744_s23, %s2283_s23   ;;  %s1683_s22 = sphi %s1742_s22, %s2282_s22   ;;  %s1679_s21 = sphi %s1740_s21, %s2281_s21  }
   0x9   : > { %p2247_p1 = scmp.eq.s32.totalorder %s1759_s25, 0  ;;  %p1277_p2 = scmp.ge.s32.totalorder %s1691_s24, 1 }
   0xa   : > { %p183_p3 = scmp.lt.s32.totalorder %s1691_s24, 3  ;;  %s1693_s28 = smov [#allocation6]  }
   0xb   : > { %p1768_p5 = por %p2247_p1, %p41_p0  ;;  %s195_s29 = sshll.u32 %s1693_s28, 4  ;;  %s196_s29 = int_to_ptr.vmem [resolvable:$true] %s195_s29 }
   0xc   : > { %p1772_p6 = pnand %p1277_p2, %p183_p3  ;;  %s1785_s7 = sadd.s32 1, %s1691_s24  }
   0xd   : > { %s2253_s26 = scalar_select %p1768_p5, 1, 0 }
   0xe   : > { %s2254_s27 = scalar_select %p1772_p6, 1, 0 }
   0xf   : > { %p1356_p7 = pneg %p1772_p6  ;;  %s28_s8 = sadd.s32 1, %s1687_s23 }
  0x10   : > { %s25_s9 = ssub.s32 %s1691_s24, %s1785_s7  ;;  %s1522_s10 = scalar_lea.vmem %s196_s29, 3072 }
  0x11   : > { %p1780_p8 = pnand %p1356_p7, %p2247_p1  ;;  %p1523_p10 = scmp.ne.s32.totalorder %s196_s29, %s1522_s10 }
  0x12   : > { %p1530_p13 = scmp.lt.s32.totalorder %s196_s29, %s196_s29  ;;  %p1531_p0 = scmp.lt.s32.totalorder %s1522_s10, %s1522_s10 }
  0x13   : > { %p2248_p9 = pneg %p1780_p8 }
  0x14   : > { %p1532_p2 = por %p1531_p0, %p1530_p13 }
  0x15   : > { %p1525_p11 = pnand %p1523_p10, %p2248_p9 }
  0x17   : > { %p1526_p12 = pneg %p1525_p11 }
  0x19   : > { %p1533_p3 = pnand %p1532_p2, %p1526_p12 }
  0x1b   : > { %1536 = shalt.err (!%p1533_p3)
}
  0x1c   : > { %s1694_s11 = smov 128   ;;  %s1695_s12 = smov 8  }
  0x1d   : > { %s2256_s1 = sld [smem:[#allocation17_spill]]  ;;  %p26_p7 = scmp.eq.s32.totalorder %s25_s9, 0 }
  0x1e   : > { %p35_p10 = scmp.ne.s32.totalorder %s1687_s23, %s1683_s22  ;;  %p36_p11 = scmp.eq.s32.totalorder %s1691_s24, 0 }
  0x1f   : > { %p1376_p12 = scmp.lt.s32.totalorder %s1691_s24, 2  ;;  %s238_s16 = sand.u32 1, %s1691_s24  }
  0x20   : > { %s1808_s15 = scalar_select %p26_p7, %s1687_s23, %s28_s8  }
  0x21   : > { %p37_p13 = por %p36_p11, %p35_p10  ;;  %s2246_s17 = sand.u32 1, %s1687_s23  }
  0x22   : > { %s1282_s18 = sshll.u32 %s2246_s17, 4  ;;  %s1338_s19 = sshll.u32 %s1691_s24, 8 }
  0x23   : > { %1359 = dma.hbm_to_vmem [thread:$0]  (!%p1780_p8), %s2256_s1, 3072, %s196_s29, [#allocation7], %s1694_s11, %s1694_s11, %s1695_s12  }
  0x24   : > { %s2257_s0 = sld [smem:[#allocation16_spill]]  ;;  %s242_s29 = scalar_lea.vmem [#allocation4], %s1282_s18 }
  0x25   : > { %s249_s9 = sshll.u32 %s242_s29, 4  ;;  %p1820_p0 = pnand %p1376_p12, %p37_p13  ;;  %s1824_s9 = int_to_ptr.vmem [resolvable:$true] %s249_s9 }
  0x26   : > { %s1696_s8 = smov [#allocation8]   ;;  %s1828_s14 = scalar_lea.sflag [#allocation5], %s238_s16 }
  0x27   : > { %s1826_s13 = sshll.u32 %s1696_s8, 4  ;;  %p1539_p3 = pneg %p1820_p0  ;;  %s209_s13 = int_to_ptr.vmem [resolvable:$true] %s1826_s13 }
  0x2a   : > { %s1818_s28 = scalar_lea.hbm %s2257_s0, %s1338_s19  ;;  %s1542_s21 = scalar_lea.hbm %s2257_s0, 512 }
  0x2b   : > { %s1537_s19 = scalar_lea.hbm %s1818_s28, 256  ;;  %p1543_p11 = scmp.lt.s32.totalorder %s1818_s28, %s2257_s0 }
  0x2c   : > { %p1538_p2 = scmp.ne.s32.totalorder %s1818_s28, %s1537_s19  ;;  %p1544_p12 = scmp.lt.s32.totalorder %s1542_s21, %s1537_s19 }
  0x2e   : > { %p1540_p7 = pnand %p1539_p3, %p1538_p2  ;;  %p1545_p13 = por %p1544_p12, %p1543_p11 }
  0x30   : > { %p1541_p10 = pneg %p1540_p7 }
  0x32   : > { %p1546_p4 = pnand %p1545_p13, %p1541_p10 }
  0x34   : > { %1549 = shalt.err (!%p1546_p4)
}
  0x35   : > { %s1550_s16 = scalar_lea.vmem %s1824_s9, 256  ;;  %s1697_s8 = smov [#allocation4]  }
  0x36   : > { %p1551_p1 = scmp.ne.s32.totalorder %s1824_s9, %s1550_s16  ;;  %s1555_s18 = sshll.u32 %s1697_s8, 4  ;;  %s1556_s18 = int_to_ptr.vmem [resolvable:$false] %s1555_s18 }
  0x37   : > { %s1557_s20 = scalar_lea.vmem %s1556_s18, 512  ;;  %p1558_p9 = scmp.lt.s32.totalorder %s1824_s9, %s1556_s18 }
  0x38   : > { %p1553_p2 = pnand %p1551_p1, %p1539_p3  ;;  %p1559_p5 = scmp.lt.s32.totalorder %s1557_s20, %s1550_s16 }
  0x3a   : > { %p1554_p7 = pneg %p1553_p2  ;;  %p1560_p6 = por %p1559_p5, %p1558_p9 }
  0x3c   : > { %p1561_p11 = pnand %p1560_p6, %p1554_p7 }
  0x3e   : > { %1564 = shalt.err (!%p1561_p11)
}
  0x3f   : > { %1369 = dma.hbm_to_vmem [thread:$0]  (!%p1820_p0), %s1818_s28, 256, %s1824_s9, %s1828_s14, %s1694_s11, %s1694_s11, %s1695_s12  }
  0x40   : > { %s1576_s17 = scalar_lea.vmem %s209_s13, 256  ;;  %p2259_p4 = pneg %p1780_p8 }
  0x41   : > { %p1577_p1 = scmp.ne.s32.totalorder %s209_s13, %s1576_s17  ;;  %p1584_p6 = scmp.lt.s32.totalorder %s209_s13, %s209_s13 }
  0x42   : > { %p1585_p9 = scmp.lt.s32.totalorder %s1576_s17, %s1576_s17 }
  0x43   : > { %p1579_p10 = pnand %p1577_p1, %p2259_p4 }
  0x44   : > { %p1586_p12 = por %p1585_p9, %p1584_p6 }
  0x45   : > { %p1580_p5 = pneg %p1579_p10 }
  0x47   : > { %p1587_p13 = pnand %p1586_p12, %p1580_p5 }
  0x49   : > { %1590 = shalt.err (!%p1587_p13)
}
  0x4a   : > { %1362 = dma.hbm_to_vmem [thread:$0]  (!%p1780_p8), %s2241_s2, 256, %s209_s13, [#allocation7], %s1694_s11, %s1694_s11, %s1695_s12  }
  0x4b   : > { %s1698_s28 = smov [#allocation9]   ;;  %p2260_p7 = pmov %p2259_p4 }
  0x4c   : > { %s224_s9 = sshll.u32 %s1698_s28, 4  ;;  %s225_s9 = int_to_ptr.vmem [resolvable:$true] %s224_s9 }
  0x4d   : > { %s1602_s29 = scalar_lea.vmem %s225_s9, 1024  ;;  %p1610_p4 = scmp.lt.s32.totalorder %s225_s9, %s225_s9 }
  0x4e   : > { %p1603_p2 = scmp.ne.s32.totalorder %s225_s9, %s1602_s29  ;;  %p1611_p10 = scmp.lt.s32.totalorder %s1602_s29, %s1602_s29 }
  0x50   : > { %p1605_p11 = pnand %p1603_p2, %p2260_p7  ;;  %p1612_p5 = por %p1611_p10, %p1610_p4 }
  0x52   : > { %p1606_p1 = pneg %p1605_p11 }
  0x54   : > { %p1613_p6 = pnand %p1612_p5, %p1606_p1 }
  0x56   : > { %1616 = shalt.err (!%p1613_p6)
}
  0x57   : > { %s1699_s16 = smov 512   ;;  %s1700_s11 = smov 32  }
  0x58   : > { %1365 = dma.hbm_to_vmem [thread:$0]  (!%p1780_p8), %s2243_s4, 1024, %s225_s9, [#allocation10], %s1699_s16, %s1699_s16, %s1700_s11  }
  0x59   : > { %s2261_s8 = sand.u32 1, %s1687_s23   ;;  %s1339_s20 = sshll.u32 %s1691_s24, 7 }
  0x5a   : > { %s1285_s18 = sshll.u32 %s2261_s8, 3  ;;  %s269_s21 = scalar_lea.hbm %s2244_s5, %s1339_s20 }
  0x5b   : > { %s263_s28 = scalar_lea.vmem [#allocation11], %s1285_s18  ;;  %s1617_s0 = scalar_lea.hbm %s269_s21, 128 }
  0x5c   : > { %s271_s29 = sshll.u32 %s263_s28, 4  ;;  %p1618_p9 = scmp.ne.s32.totalorder %s269_s21, %s1617_s0  ;;  %s272_s29 = int_to_ptr.vmem [resolvable:$true] %s271_s29 }
  0x5d   : > { %s1622_s9 = scalar_lea.hbm %s2244_s5, 256  ;;  %p1623_p8 = scmp.lt.s32.totalorder %s269_s21, %s2244_s5 }
  0x5e   : > { %p1620_p12 = pnand %p1618_p9, %p1539_p3  ;;  %p1624_p2 = scmp.lt.s32.totalorder %s1622_s9, %s1617_s0 }
  0x60   : > { %p1621_p13 = pneg %p1620_p12  ;;  %p1625_p7 = por %p1624_p2, %p1623_p8 }
  0x62   : > { %p1626_p11 = pnand %p1625_p7, %p1621_p13 }
  0x64   : > { %1629 = shalt.err (!%p1626_p11)
}
  0x65   : > { %s1630_s24 = scalar_lea.vmem %s272_s29, 128  ;;  %s1701_s12 = smov [#allocation11]  }
  0x66   : > { %p1631_p1 = scmp.ne.s32.totalorder %s272_s29, %s1630_s24  ;;  %s1635_s13 = sshll.u32 %s1701_s12, 4  ;;  %s1636_s13 = int_to_ptr.vmem [resolvable:$false] %s1635_s13 }
  0x67   : > { %s1637_s1 = scalar_lea.vmem %s1636_s13, 256  ;;  %p1638_p5 = scmp.lt.s32.totalorder %s272_s29, %s1636_s13 }
  0x68   : > { %p1633_p4 = pnand %p1631_p1, %p1539_p3  ;;  %p1639_p6 = scmp.lt.s32.totalorder %s1637_s1, %s1630_s24 }
  0x6a   : > { %p1634_p10 = pneg %p1633_p4  ;;  %p1640_p9 = por %p1639_p6, %p1638_p5 }
  0x6c   : > { %p1641_p12 = pnand %p1640_p9, %p1634_p10 }
  0x6e   : > { %1644 = shalt.err (!%p1641_p12)
}
  0x6f   : > { %1372 = dma.hbm_to_vmem [thread:$0]  (!%p1820_p0), %s269_s21, 128, %s272_s29, %s1828_s14  }
  0x70   : > { %p2262_p13 = scmp.ne.s32.totalorder %s2254_s27, 0 }
  0x71   : > { %s282_s0 = sand.u32 (!%p2262_p13), 1, %s1759_s25   ;;  %s284_s8 = sand.u32 (!%p2262_p13), 1, %s1683_s22  }
  0x72   : > { %280 = sbr.rel (%p2262_p13) target bundleno = 1044 (0x414), region = 44  ;;  %s1903_s18 = sshll.u32 (!%p2262_p13), %s284_s8, 4 }
  0x73   : > { %s283_s20 = scalar_lea.sflag (!%p2262_p13), [#allocation5], %s282_s0  ;;  %s286_s17 = scalar_lea.vmem (!%p2262_p13), [#allocation4], %s1903_s18 }
  0x74   : > { %p2263_p3 = scmp.ne.s32.totalorder (!%p2262_p13), %s2253_s26, 0 }
  0x77   : > { %1662 = dma.done.wait (%p2263_p3), %s283_s20, 256  }
  0x78   : > { %1664 = vsyncadd (%p2263_p3), %s283_s20, 4294967040  ;;  %p2264_p0 = scmp.eq.s32.totalorder %s1759_s25, 0 }
  0x7a   : > { %1666 = dma.done.wait (%p2264_p0), [#allocation7], 3328   ;;  %p2265_p8 = pmov %p2264_p0 }
  0x7b   : > { %p2266_p2 = pmov %p2264_p0 }
  0x7c   : > { %1668 = vsyncadd (%p2265_p8), [#allocation7], 4294963968 }
  0x7d   : > { %1670 = dma.done.wait (%p2266_p2), [#allocation10], 1024   ;;  %p2267_p7 = pmov %p2264_p0 }
  0x7e   : > { %s1918_s27 = sshll.u32 %s284_s8, 3 }
  0x7f   : > { %1672 = vsyncadd (%p2267_p7), [#allocation10], 4294966272  ;;  %s307_s10 = scalar_lea.vmem [#allocation11], %s1918_s27 }
  0x80   : > { %1674 = dma.done.wait (%p2263_p3), %s283_s20, 128  }
  0x81   : > { %1676 = vsyncadd (%p2263_p3), %s283_s20, 4294967168  ;;  %p2268_p11 = scmp.ne.s32.totalorder %s1759_s25, 0 }
  0x83   : > { %340 = sbr.rel (%p2268_p11) target bundleno = 138 (0x8a), region = 68 }
  0x88   : > { %vm341_vm0 = vcmask 0   ;;  %v1702_v0 = vmov 0.0  }
  0x89   : > { %342 = vst.msk [vmem:[#allocation2] sm:$0x1] %vm341_vm0, %v1702_v0  ;;  %343 = vst.msk [vmem:[#allocation3] sm:$0x1] %vm341_vm0, %v1702_v0 }
  0x8a PF: > { %v1422_v1 = vld [vmem:[#allocation6 + $0x74] ss:$8 sps:$4 sm:$0xff]   ;;  %v1424_v2 = vld [vmem:[#allocation6 + $0x70] ss:$8 sps:$4 sm:$0xff]   ;;  %v1425_v3 = vld [vmem:[#allocation6 + $0x64] ss:$8 sps:$4 sm:$0xff]   ;;  %v567_v29 = vlaneseq }
  0x8b   : > { %509 = vmatprep.subr.bf16.mxu0 %v1422_v1  ;;  %v1427_v4 = vld [vmem:[#allocation6 + $0x60] ss:$8 sps:$4 sm:$0xff]   ;;  %v1428_v5 = vld [vmem:[#allocation6 + $0x54] ss:$8 sps:$4 sm:$0xff]   ;;  %v1430_v6 = vld [vmem:[#allocation6 + $0x50] ss:$8 sps:$4 sm:$0xff]  }
  0x8c   : > { %510 = vmatpush1.bf16.msra.mxu0 %v1424_v2  ;;  %v1431_v7 = vld [vmem:[#allocation6 + $0x44] ss:$8 sps:$4 sm:$0xff]   ;;  %v1433_v8 = vld [vmem:[#allocation6 + $0x40] ss:$8 sps:$4 sm:$0xff]   ;;  %v1434_v9 = vld [vmem:[#allocation6 + $0x34] ss:$8 sps:$4 sm:$0xff]  }
  0x8d   : > { %511 = vmatprep.subr.bf16.mxu0 %v1425_v3  ;;  %v1436_v10 = vld [vmem:[#allocation6 + $0x30] ss:$8 sps:$4 sm:$0xff]   ;;  %v1437_v11 = vld [vmem:[#allocation6 + $0x24] ss:$8 sps:$4 sm:$0xff]   ;;  %vm505_vm1 = vcmask 523264   ;;  %v1934_v32 = vshrl.u32 %v567_v29, 7 }
  0x8e   : > { %v1460_v12 = vld [vmem:[%s286_s17 + $0x4] ss:$8 sps:$4 sm:$0xff]   ;;  %v1439_v13 = vld [vmem:[#allocation6 + $0x20] ss:$8 sps:$4 sm:$0xff]   ;;  %v1442_v15 = vld [vmem:[#allocation6 + $0x10] ss:$8 sps:$4 sm:$0xff]  }
  0x8f   : > { %1321 = vmatprep.mubr.msk.bf16.mxu0 %vm505_vm1, %v1460_v12  ;;  %v1440_v14 = vld [vmem:[#allocation6 + $0x14] ss:$8 sps:$4 sm:$0xff]   ;;  %v1443_v16 = vld [vmem:[#allocation6 + $0x4] ss:$8 sps:$4 sm:$0xff]   ;;  %v1445_v17 = vld [vmem:[#allocation6] ss:$8 sps:$4 sm:$0xff]  }
  0x90   : > { %512 = vmatpush1.bf16.msra.mxu0 %v1427_v4  ;;  %v1446_v18 = vld [vmem:[#allocation6 + $0xb4] ss:$8 sps:$4 sm:$0xff]   ;;  %v1448_v19 = vld [vmem:[#allocation6 + $0xb0] ss:$8 sps:$4 sm:$0xff]   ;;  %v1449_v20 = vld [vmem:[#allocation6 + $0xa4] ss:$8 sps:$4 sm:$0xff]  }
  0x91   : > { %513 = vmatprep.subr.bf16.mxu0 %v1428_v5  ;;  %v1451_v21 = vld [vmem:[#allocation6 + $0xa0] ss:$8 sps:$4 sm:$0xff]   ;;  %v1452_v22 = vld [vmem:[#allocation6 + $0x94] ss:$8 sps:$4 sm:$0xff]   ;;  %v1454_v23 = vld [vmem:[#allocation6 + $0x90] ss:$8 sps:$4 sm:$0xff]  }
  0x92   : > { %v1455_v24 = vld [vmem:[#allocation6 + $0x84] ss:$8 sps:$4 sm:$0xff]   ;;  %v1457_v25 = vld [vmem:[#allocation6 + $0x80] ss:$8 sps:$4 sm:$0xff]   ;;  %v1703_v27 = vmov 1966171168  }
  0x93   : > { %v1458_v26 = vld [vmem:[%s286_s17] ss:$8 sps:$4 sm:$0xff]   ;;  %v565_v28 = vunpack.c.l.s4 %v1703_v27  ;;  %v1322_v30 = vld.sshfl [vmem:[%s2242_s3] sm:$0x11 pattern:$0x75316420] }
  0x94   : > { %514 = vmatpush1.bf16.msra.mxu0 %v1430_v6  ;;  %v563_v33 = vcombine.high %v1322_v30, %v1322_v30  ;;  %v371_v37 = vld [vmem:[#allocation8 + $0x8] sm:$0xff]  ;;  %v370_v39 = vld [vmem:[#allocation8] sm:$0xff]  ;;  %v621_v48 = vld [vmem:[#allocation9] sm:$0xff]  ;;  %v1704_v57 = vmov 0   ;;  %vm669_vm2 = vcmask 130048   ;;  %vm1063_vm3 = vcmask 1040384  }
  0x95   : > { %515 = vmatprep.subr.bf16.mxu0 %v1431_v7  ;;  %v566_v31 = vunpack.c.0.s8 %v565_v28  ;;  %v374_v41 = vunpack.c.l.bf16 %v371_v37  ;;  %v373_v42 = vunpack.c.h.bf16 %v370_v39  ;;  %v375_v43 = vunpack.c.h.bf16 %v371_v37  ;;  %v625_v49 = vld [vmem:[#allocation9 + $0x20] sm:$0xff]  ;;  %v622_v58 = vld [vmem:[#allocation9 + $0x8] sm:$0xff]  ;;  %v623_v62 = vld [vmem:[#allocation9 + $0x10] sm:$0xff]  ;;  %p1335_p1 = scmp.ne.s32.totalorder %s1759_s25, 1 }
  0x96   : > { %v372_v44 = vunpack.c.l.bf16 %v370_v39  ;;  %v1324_v54 = vcombine.high %v621_v48, %v625_v49  ;;  %v1323_v56 = vcombine.low %v621_v48, %v625_v49  ;;  %v626_v59 = vld [vmem:[#allocation9 + $0x28] sm:$0xff]  ;;  %v627_v63 = vld [vmem:[#allocation9 + $0x30] sm:$0xff]  ;;  %v624_v6 = vld [vmem:[#allocation9 + $0x18] sm:$0xff] }
  0x97   : > { %v569_v34 = vsub.s32 %v566_v31, %v1934_v32  ;;  %v1325_v60 = vcombine.low %v622_v58, %v626_v59  ;;  %v1326_v61 = vcombine.high %v622_v58, %v626_v59  ;;  %v1328_v2 = vcombine.high %v623_v62, %v627_v63  ;;  %v628_v7 = vld [vmem:[#allocation9 + $0x38] sm:$0xff] }
  0x98   : > { %516 = vmatpush1.bf16.msra.mxu0 %v1433_v8  ;;  %v1327_v8 = vcombine.low %v623_v62, %v627_v63  ;;  %v905_v63 = vsub.s32 6, %v1934_v32 }
  0x99   : > { %517 = vmatprep.subr.bf16.mxu0 %v1434_v9  ;;  %v577_v35 = vrot.slane %v563_v33, %v569_v34  ;;  %v570_v36 = vrot.slane %v1322_v30, %v569_v34  ;;  %v1330_v9 = vcombine.high %v624_v6, %v628_v7 }
  0x9b   : > { %612 = vmatprep.mubr.bf16.mxu1 %v577_v35 }
  0x9c   : > { %518 = vmatpush1.bf16.msra.mxu0 %v1436_v10  ;;  %v1329_v10 = vcombine.low %v624_v6, %v628_v7 }
  0x9d   : > { %519 = vmatprep.subr.bf16.mxu0 %v1437_v11 }
  0xa0   : > { %520 = vmatpush1.bf16.msra.mxu0 %v1439_v13  ;;  %v1945_v13 = vsub.s32 0, %v1934_v32 }
  0xa1   : > { %521 = vmatprep.subr.bf16.mxu0 %v1440_v14 }
  0xa4   : > { %522 = vmatpush1.bf16.msra.mxu0 %v1442_v15  ;;  %v1951_v15 = vld [vmem:[%s307_s10] sm:$0xff] }
  0xa5   : > { %523 = vmatprep.subr.bf16.mxu0 %v1443_v16 }
  0xa8   : > { %524 = vmatpush1.bf16.msra.mxu0 %v1445_v17 }
  0xa9   : > { %533 = vmatprep.subr.bf16.mxu0 %v1446_v18  ;;  %v885_v18 = vsub.s32 1, %v1934_v32 }
  0xac   : > { %534 = vmatpush2.bf16.msra.mxu0 %v1448_v19 }
  0xad   : > { %535 = vmatprep.subr.bf16.mxu0 %v1449_v20 }
  0xb0   : > { %536 = vmatpush2.bf16.msra.mxu0 %v1451_v21 }
  0xb1   : > { %537 = vmatprep.subr.bf16.mxu0 %v1452_v22  ;;  %v1957_v22 = vrot.slane %v1951_v15, %v1945_v13 }
  0xb3   : > { %v1123_v29 = vsel %vm1063_vm3, %v1957_v22, 0.0 }
  0xb4   : > { %538 = vmatpush2.bf16.msra.mxu0 %v1454_v23 }
  0xb5   : > { %539 = vmatprep.subr.bf16.mxu0 %v1455_v24 }
  0xb8   : > { %540 = vmatpush2.bf16.msra.mxu0 %v1457_v25  ;;  %v1960_v25 = vrot.slane %v1951_v15, %v885_v18 }
  0xba   : > { %v1124_v30 = vsel %vm1063_vm3, %v1960_v25, 0.0 }
  0xbb   : > { %542 = vmatmul.mubr.bf16.vlgmr.msra.gmra.mxu0 %v1458_v26  ;;  %v889_v26 = vsub.s32 2, %v1934_v32 }
  0xbd   : > { %v1973_v34 = vrot.slane %v1951_v15, %v889_v26 }
 0x17b   : > { %v543_v38 = vpop.f32.mrf.mxu0 }
 0x17c   : > { %v544_v52 = vadd.f32 %v543_v38, %v372_v44  ;;  %v1125_v38 = vadd.f32 %v1124_v30, %v1123_v29 }
 0x17d   : > { %v545_v40 = vpop.f32.mrf.mxu0 }
 0x17e   : > { %v546_v50 = vadd.f32 %v545_v40, %v373_v42 }
 0x17f   : > { %v547_v45 = vpop.f32.mrf.mxu0 }
 0x180   : > { %v548_v46 = vadd.f32 %v547_v45, %v374_v41  ;;  %v1126_v41 = vsel %vm1063_vm3, %v1973_v34, 0.0  ;;  %v897_v45 = vsub.s32 4, %v1934_v32 }
 0x181   : > { %v549_v47 = vpop.f32.mrf.mxu0 }
 0x182   : > { %v550_v51 = vadd.f32 %v549_v47, %v375_v43  ;;  %v553_v55 = vpack.c.bf16 %v548_v46, %v544_v52  ;;  %v1127_v47 = vadd.f32 %v1126_v41, %v1125_v38  ;;  %v1991_v52 = vrot.slane %v1951_v15, %v897_v45 }
 0x184   : > { %v554_v53 = vpack.c.bf16 %v550_v51, %v546_v50  ;;  %v1130_v59 = vsel %vm1063_vm3, %v1991_v52, 0.0 }
 0x186   : > { %594 = vmatprep.subr.bf16.mxu1 %v554_v53 }
 0x187   : > { %595 = vmatpush1.bf16.xpose.msra.mxu1 %v553_v55 }
 0x188   : > { %687 = vmatprep.subr.bf16.mxu1 %v1324_v54  ;;  %v901_v54 = vsub.s32 5, %v1934_v32 }
 0x18e   : > { %613 = vmatmul.mubr.bf16.vlgmr.msra.gmra.mxu1 %v570_v36  ;;  %v893_v36 = vsub.s32 3, %v1934_v32 }
 0x18f   : > { %688 = vmatpush1.bf16.msra.mxu1 %v1323_v56  ;;  %705 = vmatprep.mubr.bf16.mxu1 %v1704_v57 }
 0x190   : > { %728 = vmatprep.subr.bf16.mxu1 %v1326_v61  ;;  %v1980_v44 = vrot.slane %v1951_v15, %v893_v36 }
 0x192   : > { %v1128_v49 = vsel %vm1063_vm3, %v1980_v44, 0.0 }
 0x24e   : > { %v614_v0 = vpop.f32.mrf.mxu1 }
 0x24f   : > { %v620_v1 = vpack.c.bf16 %v614_v0, %v614_v0  ;;  %v909_v0 = vsub.s32 7, %v1934_v32  ;;  %v2014_v32 = vrot.slane %v1951_v15, %v905_v63 }
 0x250   : > { %v616_v3 = vpop.f32.mrf.mxu1 }
 0x251   : > { %1331 = vmatmul.mubr.msk.bf16.vlgmr.msra.gmra.mxu1 %vm669_vm2, %v620_v1  ;;  %v2006_v3 = vrot.slane %v1951_v15, %v901_v54 }
 0x252   : > { %729 = vmatpush1.bf16.msra.mxu1 %v1325_v60  ;;  %v617_v4 = vpop.f32.mrf.mxu1  ;;  %746 = vmatprep.mubr.bf16.mxu1 %v1704_v57 }
 0x253   : > { %769 = vmatprep.subr.bf16.mxu1 %v1328_v2  ;;  %v1132_v7 = vsel %vm1063_vm3, %v2006_v3, 0.0 }
 0x254   : > { %v618_v5 = vpop.f32.mrf.mxu1 }
 0x259   : > { %1332 = vmatmul.mubr.msk.bf16.vlgmr.msra.gmra.mxu1 %vm669_vm2, %v620_v1 }
 0x25a   : > { %770 = vmatpush1.bf16.msra.mxu1 %v1327_v8  ;;  %787 = vmatprep.mubr.bf16.mxu1 %v1704_v57 }
 0x25b   : > { %810 = vmatprep.subr.bf16.mxu1 %v1330_v9 }
 0x261   : > { %1333 = vmatmul.mubr.msk.bf16.vlgmr.msra.gmra.mxu1 %vm669_vm2, %v620_v1 }
 0x262   : > { %811 = vmatpush1.bf16.msra.mxu1 %v1329_v10  ;;  %828 = vmatprep.mubr.bf16.mxu1 %v1704_v57  ;;  %v1129_v57 = vadd.f32 %v1128_v49, %v1127_v47  ;;  %v2019_v10 = vrot.slane %v1951_v15, %v909_v0 }
 0x264   : > { %v1131_v5 = vadd.f32 %v1130_v59, %v1129_v57 }
 0x269   : > { %1334 = vmatmul.mubr.msk.bf16.vlgmr.msra.gmra.mxu1 %vm669_vm2, %v620_v1 }
 0x311   : > { %v1941_v11 = vpop.f32.mrf.mxu1 }
 0x312   : > { %v838_v12 = vand.u32 2147483647, %v1941_v11  ;;  %v870_v18 = vmax.f32 %v1941_v11, 0.0  ;;  %v919_v15 = vmul.f32 %v1957_v22, %v1941_v11  ;;  %vm1039_vm4 = vcmp.ge.f32.partialorder %v1941_v11, 0.0 }
 0x313   : > { %v1947_v14 = vpop.f32.mrf.mxu1 }
 0x314   : > { %v846_v16 = vsub.f32 0.0, %v838_v12  ;;  %v839_v17 = vand.u32 2147483647, %v1947_v14  ;;  %v920_v26 = vmul.f32 %v1960_v25, %v1947_v14  ;;  %vm1040_vm5 = vcmp.ge.f32.partialorder %v1947_v14, 0.0 }
 0x315   : > { %v711_v19 = vpop.f32.mrf.mxu1 }
 0x316   : > { %v854_v20 = vmul.f32 1.442695, %v846_v16  ;;  %v847_v21 = vsub.f32 0.0, %v839_v17 }
 0x317   : > { %v712_v23 = vpop.f32.mrf.mxu1 }
 0x318   : > { %1461 = vpow2.f32 %v854_v20  ;;  %v856_v24 = vmul.f32 1.442695, %v847_v21  ;;  %v1133_v20 = vadd.f32 %v1132_v7, %v1131_v5  ;;  %v1134_v21 = vsel %vm1063_vm3, %v2014_v32, 0.0 }
 0x319   : > { %v1963_v27 = vpop.f32.mrf.mxu1  ;;  %v2029_v23 = vsel %vm1063_vm3, %v2019_v10, 0.0 }
 0x31a   : > { %1463 = vpow2.f32 %v856_v24  ;;  %v840_v28 = vand.u32 2147483647, %v1963_v27  ;;  %v871_v24 = vmax.f32 %v1947_v14, 0.0  ;;  %v2055_v54 = vadd.f32 %v1134_v21, %v1133_v20 }
 0x31b   : > { %v1970_v31 = vpop.f32.mrf.mxu1  ;;  %vm1041_vm6 = vcmp.ge.f32.partialorder %v1963_v27, 0.0 }
 0x31c   : > { %v848_v33 = vsub.f32 0.0, %v840_v28  ;;  %v841_v35 = vand.u32 2147483647, %v1970_v31  ;;  %v922_v41 = vmul.f32 %v1980_v44, %v1970_v31  ;;  %v2057_v57 = vsub.f32 %v871_v24, %v920_v26 }
 0x31d   : > { %v752_v37 = vpop.f32.mrf.mxu1  ;;  %vm1042_vm9 = vcmp.ge.f32.partialorder %v1970_v31, 0.0 }
 0x31e   : > { %v858_v39 = vmul.f32 1.442695, %v848_v33  ;;  %v849_v40 = vsub.f32 0.0, %v841_v35  ;;  %v872_v33 = vmax.f32 %v1963_v27, 0.0  ;;  %v921_v37 = vmul.f32 %v1973_v34, %v1963_v27 }
 0x31f   : > { %v753_v42 = vpop.f32.mrf.mxu1 }
 0x320   : > { %1465 = vpow2.f32 %v858_v39  ;;  %v860_v43 = vmul.f32 1.442695, %v849_v40  ;;  %v873_v40 = vmax.f32 %v1970_v31, 0.0 }
 0x321   : > { %v1983_v46 = vpop.f32.mrf.mxu1 }
 0x322   : > { %1467 = vpow2.f32 %v860_v43  ;;  %v842_v48 = vand.u32 2147483647, %v1983_v46  ;;  %v874_v43 = vmax.f32 %v1983_v46, 0.0  ;;  %v923_v45 = vmul.f32 %v1991_v52, %v1983_v46 }
 0x323   : > { %v1988_v50 = vpop.f32.mrf.mxu1  ;;  %v2064_v63 = vsub.f32 %v873_v40, %v922_v41  ;;  %vm1043_vm12 = vcmp.ge.f32.partialorder %v1983_v46, 0.0 }
 0x324   : > { %v850_v51 = vsub.f32 0.0, %v842_v48  ;;  %v843_v53 = vand.u32 2147483647, %v1988_v50  ;;  %v875_v47 = vmax.f32 %v1988_v50, 0.0  ;;  %v2066_v0 = vsub.f32 %v874_v43, %v923_v45 }
 0x325   : > { %v1995_v55 = vpop.eup %1461  ;;  %v793_v56 = vpop.f32.mrf.mxu1  ;;  %vm1044_vm13 = vcmp.ge.f32.partialorder %v1988_v50, 0.0 }
 0x326   : > { %v935_v58 = vadd.f32 1.0, %v1995_v55  ;;  %v851_v61 = vsub.f32 0.0, %v843_v53  ;;  %v862_v2 = vmul.f32 1.442695, %v850_v51  ;;  %v938_v30 = vmul.f32 -0.5, %v1995_v55 }
 0x327   : > { %v2000_v60 = vpop.eup %1463  ;;  %v794_v62 = vpop.f32.mrf.mxu1  ;;  %v924_v51 = vmul.f32 %v2006_v3, %v1988_v50  ;;  %v927_v53 = vsub.f32 %v870_v18, %v919_v15 }
 0x328   : > { %1469 = vlog2.f32 %v935_v58  ;;  %v944_v1 = vadd.f32 1.0, %v2000_v60  ;;  %v864_v8 = vmul.f32 1.442695, %v851_v61  ;;  %v939_v48 = vadd.f32 1.0, %v938_v30 }
 0x329   : > { %1471 = vrcp.f32 %v935_v58  ;;  %v2008_v4 = vpop.f32.mrf.mxu1  ;;  %v947_v49 = vmul.f32 -0.5, %v2000_v60  ;;  %v941_v61 = vand.u32 2147483647, %v1995_v55  ;;  %v2062_v62 = vsub.f32 %v872_v33, %v921_v37 }
 0x32a   : > { %1473 = vlog2.f32 %v944_v1  ;;  %v844_v6 = vand.u32 2147483647, %v2008_v4  ;;  %v2070_v7 = vsub.f32 %v875_v47, %v924_v51  ;;  %v876_v18 = vmax.f32 %v2008_v4, 0.0 }
 0x32b   : > { %1475 = vrcp.f32 %v944_v1  ;;  %v2016_v9 = vpop.f32.mrf.mxu1  ;;  %v948_v5 = vadd.f32 1.0, %v947_v49  ;;  %vm2087_vm7 = vcmp.lt.f32.partialorder %v941_v61, 0.0004427343  ;;  %vm1045_vm15 = vcmp.ge.f32.partialorder %v2008_v4, 0.0 }
 0x32c   : > { %1477 = vpow2.f32 %v862_v2  ;;  %v852_v12 = vsub.f32 0.0, %v844_v6  ;;  %v845_v16 = vand.u32 2147483647, %v2016_v9  ;;  %v940_v2 = vmul.f32 %v1995_v55, %v939_v48 }
 0x32d   : > { %v2022_v17 = vpop.eup %1465  ;;  %v834_v19 = vpop.f32.mrf.mxu1  ;;  %1479 = vpow2.f32 %v864_v8  ;;  %v950_v6 = vand.u32 2147483647, %v2000_v60  ;;  %v877_v33 = vmax.f32 %v2016_v9, 0.0  ;;  %vm1046_vm0 = vcmp.ge.f32.partialorder %v2016_v9, 0.0 }
 0x32e   : > { %v953_v28 = vadd.f32 1.0, %v2022_v17  ;;  %v853_v35 = vsub.f32 0.0, %v845_v16  ;;  %v866_v39 = vmul.f32 1.442695, %v852_v12  ;;  %v956_v58 = vmul.f32 -0.5, %v2022_v17 }
 0x32f   : > { %v2037_v29 = vpop.eup %1467  ;;  %v835_v36 = vpop.f32.mrf.mxu1  ;;  %v925_v19 = vmul.f32 %v2014_v32, %v2008_v4  ;;  %v959_v26 = vand.u32 2147483647, %v2022_v17  ;;  %vm2092_vm8 = vcmp.lt.f32.partialorder %v950_v6, 0.0004427343 }
 0x330   : > { %1481 = vlog2.f32 %v953_v28  ;;  %v962_v38 = vadd.f32 1.0, %v2037_v29  ;;  %v868_v42 = vmul.f32 1.442695, %v853_v35  ;;  %v965_v16 = vmul.f32 -0.5, %v2037_v29 }
 0x331   : > { %1483 = vrcp.f32 %v953_v28  ;;  %v957_v24 = vadd.f32 1.0, %v956_v58  ;;  %v968_v28 = vand.u32 2147483647, %v2037_v29  ;;  %v926_v35 = vmul.f32 %v2019_v10, %v2016_v9 }
 0x332   : > { %1485 = vlog2.f32 %v962_v38  ;;  %v966_v41 = vadd.f32 1.0, %v965_v16  ;;  %vm2108_vm10 = vcmp.lt.f32.partialorder %v959_v26, 0.0004427343 }
 0x333   : > { %1487 = vrcp.f32 %v962_v38  ;;  %v958_v47 = vmul.f32 %v2022_v17, %v957_v24  ;;  %vm2112_vm11 = vcmp.lt.f32.partialorder %v968_v28, 0.0004427343  ;;  %v2116_v58 = vsub.f32 %v877_v33, %v926_v35 }
 0x334   : > { %1489 = vpow2.f32 %v866_v39 }
 0x335   : > { %v1470_v56 = vpop.eup %1469  ;;  %1491 = vpow2.f32 %v868_v42  ;;  %v2101_v42 = vsub.f32 %v876_v18, %v925_v19 }
 0x336   : > { %v1472_v59 = vpop.eup %1471  ;;  %v937_v12 = vmul.f32 0.6931472, %v1470_v56 }
 0x337   : > { %v1474_v1 = vpop.eup %1473  ;;  %v1047_v21 = vmul.f32 %v1472_v59, %v1995_v55  ;;  %v949_v55 = vmul.f32 %v2000_v60, %v948_v5 }
 0x338   : > { %v1476_v8 = vpop.eup %1475  ;;  %v946_v37 = vmul.f32 0.6931472, %v1474_v1  ;;  %v943_v40 = vsel %vm2087_vm7, %v940_v2, %v937_v12 }
 0x339   : > { %v2077_v20 = vpop.eup %1477  ;;  %v1048_v15 = vmul.f32 %v1476_v8, %v2000_v60  ;;  %v1055_v45 = vsel %vm1039_vm4, %v1472_v59, %v1047_v21  ;;  %v1007_v59 = vadd.f32 %v943_v40, %v927_v53 }
 0x33a   : > { %v971_v30 = vadd.f32 1.0, %v2077_v20  ;;  %v2096_v39 = vpop.eup %1479  ;;  %v952_v14 = vsel %vm2092_vm8, %v949_v55, %v946_v37  ;;  %v1081_v5 = vmul.f32 %v1055_v45, %v1957_v22  ;;  %v974_v12 = vmul.f32 -0.5, %v2077_v20 }
 0x33b   : > { %v1056_v60 = vsel %vm1040_vm5, %v1476_v8, %v1048_v15  ;;  %v980_v1 = vadd.f32 1.0, %v2096_v39  ;;  %v967_v8 = vmul.f32 %v2037_v29, %v966_v41  ;;  %v1106_v53 = vsel %vm1063_vm3, %v1055_v45, 0.0 }
 0x33c   : > { %1493 = vlog2.f32 %v971_v30  ;;  %v1107_v6 = vsel %vm1063_vm3, %v1056_v60, 0.0  ;;  %v1008_v22 = vadd.f32 %v952_v14, %v2057_v57  ;;  %v1082_v21 = vmul.f32 %v1056_v60, %v1960_v25 }
 0x33d   : > { %v1482_v43 = vpop.eup %1481  ;;  %1495 = vrcp.f32 %v971_v30  ;;  %v1064_v26 = vsel %vm1063_vm3, %v1007_v59, 0.0  ;;  %v1108_v28 = vadd.f32 %v1107_v6, %v1106_v53  ;;  %v975_v33 = vadd.f32 1.0, %v974_v12 }
 0x33e   : > { %v1484_v49 = vpop.eup %1483  ;;  %v955_v51 = vmul.f32 0.6931472, %v1482_v43  ;;  %1497 = vrcp.f32 %v980_v1  ;;  %v983_v35 = vmul.f32 -0.5, %v2096_v39  ;;  %v1089_v37 = vsel %vm1063_vm3, %v1081_v5, 0.0 }
 0x33f   : > { %v1486_v11 = vpop.eup %1485  ;;  %v1049_v61 = vmul.f32 %v1484_v49, %v2022_v17  ;;  %v1065_v55 = vsel %vm1063_vm3, %v1008_v22, 0.0  ;;  %v1090_v38 = vsel %vm1063_vm3, %v1082_v21, 0.0  ;;  %vm1154_vm5 = vcmask 0  }
 0x340   : > { %v1488_v2 = vpop.eup %1487  ;;  %v961_v15 = vsel %vm2108_vm10, %v958_v47, %v955_v51  ;;  %v964_v30 = vmul.f32 0.6931472, %v1486_v11  ;;  %v1091_v47 = vadd.f32 %v1090_v38, %v1089_v37  ;;  %v986_v11 = vand.u32 2147483647, %v2096_v39 }
 0x341   : > { %v2126_v16 = vpop.eup %1489  ;;  %v1057_v18 = vsel %vm1041_vm6, %v1484_v49, %v1049_v61  ;;  %v1050_v17 = vmul.f32 %v1488_v2, %v2037_v29  ;;  %v1009_v57 = vadd.f32 %v961_v15, %v2062_v62  ;;  %v977_v62 = vand.u32 2147483647, %v2077_v20 }
 0x342   : > { %v2132_v19 = vpop.eup %1491  ;;  %v989_v24 = vadd.f32 1.0, %v2126_v16  ;;  %v1109_v29 = vsel %vm1063_vm3, %v1057_v18, 0.0  ;;  %v1083_v25 = vmul.f32 %v1057_v18, %v1973_v34  ;;  %v970_v40 = vsel %vm2112_vm11, %v967_v8, %v964_v30 }
 0x343   : > { %v998_v27 = vadd.f32 1.0, %v2132_v19  ;;  %v1058_v36 = vsel %vm1042_vm9, %v1488_v2, %v1050_v17  ;;  %v1110_v41 = vadd.f32 %v1109_v29, %v1108_v28  ;;  %v976_v34 = vmul.f32 %v2077_v20, %v975_v33 }
 0x344   : > { %1499 = vrcp.f32 %v989_v24  ;;  %v1084_v31 = vmul.f32 %v1058_v36, %v1980_v44  ;;  %v1111_v43 = vsel %vm1063_vm3, %v1058_v36, 0.0  ;;  %v1067_v60 = vsel %vm1063_vm3, %v1009_v57, 0.0 }
 0x345   : > { %1501 = vrcp.f32 %v998_v27  ;;  %v1092_v48 = vsel %vm1063_vm3, %v1083_v25, 0.0  ;;  %v984_v49 = vadd.f32 1.0, %v983_v35  ;;  %v1010_v51 = vadd.f32 %v970_v40, %v2064_v63 }
 0x346   : > { %1503 = vlog2.f32 %v980_v1  ;;  %v992_v44 = vmul.f32 -0.5, %v2126_v16  ;;  %v1066_v14 = vadd.f32 %v1065_v55, %v1064_v26  ;;  %vm978_vm14 = vcmp.lt.f32.partialorder %v977_v62, 0.0004427343 }
 0x347   : > { %1505 = vlog2.f32 %v989_v24  ;;  %v1112_v61 = vadd.f32 %v1111_v43, %v1110_v41  ;;  %v1001_v1 = vmul.f32 -0.5, %v2132_v19  ;;  %v1093_v6 = vadd.f32 %v1092_v48, %v1091_v47 }
 0x348   : > { %1507 = vlog2.f32 %v998_v27  ;;  %v1094_v63 = vsel %vm1063_vm3, %v1084_v31, 0.0  ;;  %v985_v12 = vmul.f32 %v2096_v39, %v984_v49  ;;  %v995_v53 = vand.u32 2147483647, %v2126_v16 }
 0x349   : > { %v1494_v45 = vpop.eup %1493  ;;  %v1068_v18 = vadd.f32 %v1067_v60, %v1066_v14  ;;  %vm2173_vm1 = vcmp.lt.f32.partialorder %v986_v11, 0.0004427343  ;;  %v993_v15 = vadd.f32 1.0, %v992_v44  ;;  %v1002_v28 = vadd.f32 1.0, %v1001_v1 }
 0x34a   : > { %v973_v56 = vmul.f32 0.6931472, %v1494_v45  ;;  %v1496_v59 = vpop.eup %1495  ;;  %v1095_v27 = vadd.f32 %v1094_v63, %v1093_v6  ;;  %v1004_v29 = vand.u32 2147483647, %v2132_v19  ;;  %vm2186_vm2 = vcmp.lt.f32.partialorder %v995_v53, 0.0004427343 }
 0x34b   : > { %v1051_v5 = vmul.f32 %v1496_v59, %v2077_v20  ;;  %v1498_v17 = vpop.eup %1497  ;;  %v1069_v20 = vsel %vm1063_vm3, %v1010_v51, 0.0  ;;  %v994_v50 = vmul.f32 %v2126_v16, %v993_v15  ;;  %v1003_v41 = vmul.f32 %v2132_v19, %v1002_v28 }
 0x34c   : > { %v979_v2 = vsel %vm978_vm14, %v976_v34, %v973_v56  ;;  %v1052_v24 = vmul.f32 %v1498_v17, %v2096_v39  ;;  %v1070_v39 = vadd.f32 %v1069_v20, %v1068_v18  ;;  %vm1005_vm4 = vcmp.lt.f32.partialorder %v1004_v29, 0.0004427343 }
 0x34d   : > { %v1011_v8 = vadd.f32 %v979_v2, %v2066_v0  ;;  %v1059_v22 = vsel %vm1043_vm12, %v1496_v59, %v1051_v5  ;;  %v1137_v63 = vadd.f32 %v2029_v23, %v2055_v54  ;;  %v1152_v23 = vld [vmem:[#allocation2] sm:$0x1] }
 0x34e   : > { %v1113_v0 = vsel %vm1063_vm3, %v1059_v22, 0.0  ;;  %v1085_v26 = vmul.f32 %v1059_v22, %v1991_v52  ;;  %v1060_v35 = vsel %vm1044_vm13, %v1498_v17, %v1052_v24 }
 0x34f   : > { %v1114_v30 = vadd.f32 %v1113_v0, %v1112_v61  ;;  %v1071_v46 = vsel %vm1063_vm3, %v1011_v8, 0.0  ;;  %v1115_v37 = vsel %vm1063_vm3, %v1060_v35, 0.0  ;;  %v1086_v55 = vmul.f32 %v1060_v35, %v2006_v3 }
 0x350   : > { %v1096_v57 = vsel %vm1063_vm3, %v1085_v26, 0.0  ;;  %v1072_v31 = vadd.f32 %v1071_v46, %v1070_v39 }
 0x351   : > { %v1500_v33 = vpop.eup %1499  ;;  %v1097_v38 = vadd.f32 %v1096_v57, %v1095_v27  ;;  %v1116_v45 = vadd.f32 %v1115_v37, %v1114_v30  ;;  %v1098_v60 = vsel %vm1063_vm3, %v1086_v55, 0.0 }
 0x352   : > { %v1502_v36 = vpop.eup %1501  ;;  %v1053_v52 = vmul.f32 %v1500_v33, %v2126_v16 }
 0x353   : > { %v1504_v40 = vpop.eup %1503  ;;  %v1054_v62 = vmul.f32 %v1502_v36, %v2132_v19  ;;  %v1099_v16 = vadd.f32 %v1098_v60, %v1097_v38 }
 0x354   : > { %v1506_v34 = vpop.eup %1505  ;;  %v1061_v43 = vsel %vm1045_vm15, %v1500_v33, %v1053_v52  ;;  %v982_v47 = vmul.f32 0.6931472, %v1504_v40  ;;  %v1156_v33 = vld [vmem:[#allocation3] sm:$0x1] }
 0x355   : > { %v1508_v48 = vpop.eup %1507  ;;  %v1062_v3 = vsel %vm1046_vm0, %v1502_v36, %v1054_v62  ;;  %v1117_v49 = vsel %vm1063_vm3, %v1061_v43, 0.0  ;;  %v1087_v51 = vmul.f32 %v1061_v43, %v2014_v32  ;;  %v991_v59 = vmul.f32 0.6931472, %v1506_v34 }
 0x356   : > { %v1118_v56 = vadd.f32 %v1117_v49, %v1116_v45  ;;  %v1119_v19 = vsel %vm1063_vm3, %v1062_v3, 0.0  ;;  %v1088_v11 = vmul.f32 %v1062_v3, %v2019_v10  ;;  %v988_v4 = vsel %vm2173_vm1, %v985_v12, %v982_v47 }
 0x357   : > { %v1100_v44 = vsel %vm1063_vm3, %v1087_v51, 0.0  ;;  %v1000_v14 = vmul.f32 0.6931472, %v1508_v48  ;;  %v1012_v9 = vadd.f32 %v988_v4, %v2070_v7  ;;  %v997_v32 = vsel %vm2186_vm2, %v994_v50, %v991_v59 }
 0x358   : > { %v1120_v61 = vadd.f32 %v1119_v19, %v1118_v56  ;;  %v1101_v1 = vadd.f32 %v1100_v44, %v1099_v16  ;;  %v1102_v2 = vsel %vm1063_vm3, %v1088_v11, 0.0  ;;  %v1013_v8 = vadd.f32 %v997_v32, %v2101_v42 }
 0x359   : > { %v1006_v5 = vsel %vm1005_vm4, %v1003_v41, %v1000_v14  ;;  %v1073_v10 = vsel %vm1063_vm3, %v1012_v9, 0.0 }
 0x35a   : > { %1121 = vadd.xlane.f32.xlu0 %v1120_v61  ;;  %v1103_v6 = vadd.f32 %v1102_v2, %v1101_v1  ;;  %v1014_v7 = vadd.f32 %v1006_v5, %v2116_v58  ;;  %v1074_v12 = vadd.f32 %v1073_v10, %v1072_v31  ;;  %v1075_v53 = vsel %vm1063_vm3, %v1013_v8, 0.0 }
 0x35c   : > { %1104 = vadd.xlane.f32.xlu1 %v1103_v6  ;;  %v1077_v18 = vsel %vm1063_vm3, %v1014_v7, 0.0  ;;  %v1076_v17 = vadd.f32 %v1075_v53, %v1074_v12 }
 0x35e   : > { %1138 = vadd.xlane.f32.xlu0 %v1137_v63  ;;  %v1078_v22 = vadd.f32 %v1077_v18, %v1076_v17 }
 0x360   : > { %1079 = vadd.xlane.f32.xlu1 %v1078_v22 }
 0x3e3   : > { %v1122_v21 = vpop.xlane.xlu0 %1121 }
 0x3e5   : > { %v1105_v15 = vpop.xlane.xlu1 %1104 }
 0x3e6   : > { %v1142_v28 = vmul.f32 2.0, %v1105_v15 }
 0x3e7   : > { %v1139_v20 = vpop.xlane.xlu0 %1138 }
 0x3e8   : > { %v1145_v24 = vadd.f32 %v1139_v20, %v1122_v21  ;;  %v1144_v30 = vmul.f32 0.001, %v1142_v28 }
 0x3e9   : > { %v1080_v54 = vpop.xlane.xlu1 %1079 }
 0x3ea   : > { %v1146_v0 = vmul.f32 0.001, %v1145_v24  ;;  %v1141_v42 = vmul.f32 0.0009765625, %v1080_v54  ;;  %v1147_v27 = vadd.f32 1e-06, %v1144_v30 }
 0x3ec   : > { %v1148_v26 = vadd.f32 1e-06, %v1146_v0  ;;  %v1153_v58 = vadd.f32 %v1152_v23, %v1141_v42 }
 0x3ee   : > { %1509 = vrcp.f32 %v1148_v26  ;;  %1155 = vst.msk [vmem:[#allocation2] sm:$0x1] %vm1154_vm5, %v1153_v58 }
 0x3fb   : > { %v1510_v29 = vpop.eup %1509 }
 0x3fc   : > { %v1150_v46 = vmul.f32 %v1510_v29, %v1147_v27 }
 0x3fe   : > { %v1151_v35 = vsub.f32 1.0, %v1150_v46  ;;  %1162 = sbr.rel (%p1335_p1) target bundleno = 1044 (0x414), region = 72 }
 0x400   : > { %v1157_v57 = vadd.f32 %v1156_v33, %v1151_v35 }
 0x402   : > { %1158 = vst.msk [vmem:[#allocation3] sm:$0x1] %vm1154_vm5, %v1157_v57 }
 0x403   : > { %v1163_v25 = vld [vmem:[#allocation2] sm:$0x1]  ;;  %vm1184_vm6 = vcmask 1041408   ;;  %vm1186_vm7 = vcmask 2048  }
 0x404   : > { %v1164_v36 = vmul.f32 2.0, %v1163_v25 }
 0x406   : > { %v1166_v37 = vmul.f32 0.5, %v1164_v36 }
 0x409   : > { %v1167_v39 = vld [vmem:[#allocation3] sm:$0x1] }
 0x40a   : > { %v1168_v52 = vmul.f32 0.5, %v1167_v39 }
 0x40c   : > { %v1169_v55 = vmul.f32 0.5, %v1168_v52 }
 0x40e   : > { %v1170_v38 = vadd.f32 %v1169_v55, %v1166_v37  ;;  %v1175_v40 = vrot.slane %v1169_v55, %v1945_v13 }
 0x410   : > { %v1181_v62 = vrot.slane %v1170_v38, %v1945_v13  ;;  %v1183_v50 = vsel %vm1063_vm3, %v1166_v37, %v1175_v40 }
 0x412   : > { %v1185_v41 = vsel %vm1184_vm6, %v1183_v50, %v1181_v62 }
 0x413   : > { %1187 = vst.msk [vmem:[%s2245_s6] sm:$0x7] %vm1186_vm7, %v1185_v41 }
 0x414 PF: > { %p18_p4 = scmp.ge.s32.totalorder %s1785_s7, 4   ;;  %s2281_s21 = smov %s1683_s22 }
 0x415   : > { %s2282_s22 = smov %s1687_s23  ;;  %s2283_s23 = smov %s1808_s15 }
 0x416   : > { %s2284_s24 = smov %s1785_s7  ;;  %20 = sbr.rel (!%p18_p4) target bundleno = 8 (0x8), region = 111 }
 0x41b   :  { %1199 = vsyncpa [#allocation5], 1 }
 0x41c   :  { %1201 = vsyncpa [#allocation5 + $0x1], 1 }
 0x41d   :  { %1202 = vsyncpa [#allocation7], 1 }
 0x41e   :  { %1203 = vsyncpa [#allocation10], 1 }

</bundles_post_ra>
